<compile_context>
chip_gen: v6e
topology: v6e:2x2x1
jax: 0.10.0
libtpu: 0.0.40
codegen_flags: <defaults>
</compile_context>

<pallas_src>
import functools
import math

import jax
import jax.numpy as jnp
from jax.experimental import pallas as pl
from jax.experimental.pallas import tpu as pltpu

_LANE = 128
_BLOCK_BUDGET_ELEMS = 1 << 20           # ~4 MiB f32 per input block (aligned path)
_HARD_CAP_ELEMS = 2 * _BLOCK_BUDGET_ELEMS   # absolute cap for full-extent fallbacks
_MAX_BLOCK_LANES = 16384                # cap on spatial (lane) block extent
_FULL_S_MAX = 1 << 16                   # ragged spatial up to this -> one full block
_VMEM_LIMIT_FLOOR = 32 << 20
_VMEM_LIMIT_CEIL = 48 << 20             # headroom under v7x's 64 MiB physical VMEM


def _tversky_sums_kernel(x_ref, t_ref, tp_ref, sx_ref, st_ref, *,
                         target_thresh, from_logit):
    """One (rows x lanes) block: accumulate per-row TP / sum(x) / sum(t)."""
    @pl.when(pl.program_id(2) == 0)
    def _init():
        tp_ref[...] = jnp.zeros_like(tp_ref)
        sx_ref[...] = jnp.zeros_like(sx_ref)
        st_ref[...] = jnp.zeros_like(st_ref)

    x = x_ref[...].astype(jnp.float32)
    if from_logit:
        x = 1.0 / (1.0 + jnp.exp(-x))        # sigmoid (exp on EUP); safe at +/-inf
    t = (t_ref[...].astype(jnp.float32) > target_thresh).astype(jnp.float32)

    # FP = Sx - TP, FN = St - TP are recovered algebraically in the epilogue.
    tp_ref[...] += jnp.sum(t * x, axis=1, keepdims=True)
    sx_ref[...] += jnp.sum(x, axis=1, keepdims=True)
    st_ref[...] += jnp.sum(t, axis=1, keepdims=True)


def _round_up(x, m):
    return ((x + m - 1) // m) * m


def _largest_divisor_block(extent, unit, cap):
    """Largest b <= cap with b % unit == 0 and extent % b == 0 (extent % unit == 0)."""
    m = extent // unit
    for k in range(min(m, max(1, cap // unit)), 0, -1):
        if m % k == 0:
            return unit * k
    return unit


def _sublane_unit(dtype):
    """Minimum sublane tile for a dtype: 8 (32-bit), 16 (16-bit), 32 (8-bit/bool)."""
    itemsize = jnp.dtype(dtype).itemsize
    if itemsize >= 4:
        return 8
    if itemsize == 2:
        return 16
    return 32


def _neutral_target_pad_value(dtype):
    """Pad value for targets that is guaranteed to binarize to 0."""
    if jnp.issubdtype(dtype, jnp.floating):
        return float(jnp.finfo(dtype).min)
    if jnp.issubdtype(dtype, jnp.integer):
        return int(jnp.iinfo(dtype).min)
    return False


def _neutral_x_pad_value(dtype, from_logit):
    """Pad value for predictions that maps to 0 (after optional sigmoid)."""
    if not from_logit:
        return 0
    if jnp.issubdtype(dtype, jnp.floating):
        return float(jnp.finfo(dtype).min)
    if jnp.issubdtype(dtype, jnp.integer):
        return int(jnp.iinfo(dtype).min)
    return 0


def tversky_loss(outputs, targets, *, factor_false_positives=0.7,
                 reduction="mean", target_thresh=0.0, from_logit=False,
                 block_rows=None, block_lanes=None):
    """Pallas implementation of TverskyLoss.forward.

    Matches the torch module: targets are binarized with `target_thresh`, the
    Tversky index is computed per instance over the last two axes (last axis
    only for 1D inputs), and the per-instance losses are reduced with
    `reduction` ("mean", "sum", "none", or a callable).
    """
    if not 0.0 <= factor_false_positives <= 1.0:
        raise ValueError("factor_false_positives must be in [0,1] but was {}"
                         .format(factor_false_positives))
    if outputs.shape != targets.shape:
        raise ValueError("Outputs ({}) and labels ({}) have different sizes!"
                         .format(outputs.shape, targets.shape))
    if outputs.ndim < 1:
        raise ValueError("Output dimension ({}) too small; must be at least 1D"
                         .format(outputs.shape))

    shape = outputs.shape
    if outputs.ndim == 1:
        group_shape, n_groups, n_spatial = (), 1, int(shape[0])
    else:
        group_shape = shape[:-2]
        n_groups = int(math.prod(group_shape)) if group_shape else 1
        n_spatial = int(shape[-2] * shape[-1])

    # Lane-dense 2D view (row-major reshape, no copy): (instances, spatial).
    x2d = outputs.reshape(n_groups, n_spatial)
    t2d = targets.reshape(n_groups, n_spatial)

    row_unit = max(_sublane_unit(outputs.dtype), _sublane_unit(targets.dtype))
    x_pad = _neutral_x_pad_value(outputs.dtype, from_logit)
    t_pad = _neutral_target_pad_value(targets.dtype)
    n_groups_valid = n_groups

    # ---- spatial (lane) axis -------------------------------------------------
    s_full = False
    if n_spatial % _LANE != 0:
        if n_spatial <= _FULL_S_MAX:
            s_full = True                     # small ragged: one full-extent block
        else:
            s_pad = _round_up(n_spatial, _LANE)
            x2d = jnp.pad(x2d, ((0, 0), (0, s_pad - n_spatial)), constant_values=x_pad)
            t2d = jnp.pad(t2d, ((0, 0), (0, s_pad - n_spatial)), constant_values=t_pad)
            n_spatial = s_pad
    ts = n_spatial if s_full else _largest_divisor_block(n_spatial, _LANE, _MAX_BLOCK_LANES)
    if block_lanes is not None:
        block_lanes = int(block_lanes)
        if (n_spatial % block_lanes != 0
                or not (block_lanes == n_spatial or block_lanes % _LANE == 0)):
            raise ValueError("block_lanes must divide the (padded) spatial extent "
                             "and be lane-aligned or the full extent")
        ts = block_lanes

    # ---- group (sublane) axis --------------------------------------------------
    # Hard byte cap: if an unaligned instance axis would make the full-extent
    # fallback block too big, pad it instead (padding is numerically exact).
    if n_groups % row_unit != 0 and n_groups * ts > _HARD_CAP_ELEMS:
        g_pad = _round_up(n_groups, row_unit)
        x2d = jnp.pad(x2d, ((0, g_pad - n_groups), (0, 0)), constant_values=x_pad)
        t2d = jnp.pad(t2d, ((0, g_pad - n_groups), (0, 0)), constant_values=t_pad)
        n_groups = g_pad
    if n_groups % row_unit == 0:
        budget_rows = max(row_unit, (_BLOCK_BUDGET_ELEMS // ts) // row_unit * row_unit)
        tg = _largest_divisor_block(n_groups, row_unit, min(n_groups, budget_rows))
    else:
        tg = n_groups                          # small unaligned: one full-extent block
    if block_rows is not None:
        block_rows = int(block_rows)
        if (n_groups % block_rows != 0
                or not (block_rows == n_groups or block_rows % row_unit == 0)):
            raise ValueError("block_rows must divide the (padded) instance count "
                             "and be sublane-aligned or the full extent")
        tg = block_rows

    # ---- megacore: guarantee >=2 parallel blocks for v7x's two TensorCores ----
    n_row_blocks = n_groups // tg
    n_halves = 1
    if n_row_blocks < 2:
        if block_lanes is None and not s_full and n_spatial % (2 * _LANE) == 0:
            ts = _largest_divisor_block(n_spatial // 2, _LANE, _MAX_BLOCK_LANES)
            n_halves = 2
        elif n_spatial % (2 * ts) == 0:
            n_halves = 2
    per_half = n_spatial // (n_halves * ts)
    grid = (n_halves, n_row_blocks, per_half)

    in_spec = pl.BlockSpec((tg, ts), lambda h, gi, si: (gi, h * per_half + si))
    sum_spec = pl.BlockSpec((None, tg, 1), lambda h, gi, si: (h, gi, 0))
    sum_shape = jax.ShapeDtypeStruct((n_halves, n_groups, 1), jnp.float32)

    # Explicit VMEM limit: double-buffered inputs + tiny outputs + margin,
    # clamped to [32 MiB, 48 MiB] (above v5e's 16 MiB scoped default, below
    # v7x's 64 MiB physical VMEM).
    x_item = jnp.dtype(x2d.dtype).itemsize
    t_item = jnp.dtype(t2d.dtype).itemsize
    need = 2 * tg * ts * (x_item + t_item) + 6 * n_halves * n_groups * 4 + (4 << 20)
    vmem_limit = int(min(_VMEM_LIMIT_CEIL, max(_VMEM_LIMIT_FLOOR, need)))

    tp, sx, st = pl.pallas_call(
        functools.partial(_tversky_sums_kernel,
                          target_thresh=float(target_thresh),
                          from_logit=bool(from_logit)),
        out_shape=(sum_shape, sum_shape, sum_shape),
        grid=grid,
        in_specs=[in_spec, in_spec],
        out_specs=(sum_spec, sum_spec, sum_spec),
        compiler_params=pltpu.CompilerParams(
            dimension_semantics=("parallel", "parallel", "arbitrary"),
            vmem_limit_bytes=vmem_limit),
    )(x2d, t2d)

    # Fold the parallel spatial halves, drop padded rows, tiny combine in JAX.
    tp = tp.sum(axis=0)[:n_groups_valid, 0]
    sx = sx.sum(axis=0)[:n_groups_valid, 0]
    st = st.sum(axis=0)[:n_groups_valid, 0]

    b = float(factor_false_positives)
    denom = b * sx + (1.0 - b) * st           # == TP + b*FP + (1-b)*FN
    loss = 1.0 - tp / denom

    if callable(reduction):
        return reduction(loss.reshape(group_shape))
    if reduction == "mean":
        return jnp.mean(loss)
    if reduction == "sum":
        return jnp.sum(loss)
    if reduction in ("none", None):
        return loss.reshape(group_shape)
    raise ValueError(f"unknown reduction {reduction!r}")


def _reference(outputs, targets, factor_false_positives=0.7, reduction="mean",
               target_thresh=0.0, from_logit=False):
    """Plain-JAX reference mirroring the torch module (verification only)."""
    x = outputs.astype(jnp.float32)
    t = (targets > target_thresh).astype(jnp.float32)
    if from_logit:
        x = jax.nn.sigmoid(x)
    ndim = outputs.ndim
    axes = (ndim - 1,) if ndim == 1 else (ndim - 1, ndim - 2)
    tp = jnp.sum(t * x, axis=axes)
    fp = jnp.sum(-(t - 1.0) * x, axis=axes)
    fn = jnp.sum(-t * (x - 1.0), axis=axes)
    b = factor_false_positives
    tversky = tp / (tp + b * fp + (1.0 - b) * fn)
    loss = 1.0 - tversky
    if reduction == "mean":
        return jnp.mean(loss)
    if reduction == "sum":
        return jnp.sum(loss)
    return loss


if __name__ == "__main__":
    key = jax.random.PRNGKey(0)
    kx, kt, kl, kb = jax.random.split(key, 4)

    # NCHW segmentation-style inputs: predictions in [0,1], raw-valued targets.
    x = jax.random.uniform(kx, (2, 4, 16, 16), jnp.float32)
    t = jax.random.uniform(kt, (2, 4, 16, 16), jnp.float32, minval=-1.0, maxval=1.0)

    checks = []

    # 1) default module config: factor=0.7, mean reduction, target_thresh=0
    #    (exercises the 2-way parallel spatial split: grid (2, 1, 1)).
    checks.append((tversky_loss(x, t), _reference(x, t)))

    # 2) from_logit path + sum reduction + non-default factor / threshold.
    logits = jax.random.normal(kl, (2, 4, 16, 16), jnp.float32)
    checks.append((
        tversky_loss(logits, t, factor_false_positives=0.3, reduction="sum",
                     target_thresh=0.25, from_logit=True),
        _reference(logits, t, factor_false_positives=0.3, reduction="sum",
                   target_thresh=0.25, from_logit=True)))

    # 3) ragged spatial extent (full-extent block path), per-instance result.
    xr = jax.random.uniform(kx, (3, 5, 7, 9), jnp.float32)
    tr = jax.random.uniform(kt, (3, 5, 7, 9), jnp.float32, minval=-1.0, maxval=1.0)
    out3 = tversky_loss(xr, tr, reduction="none")
    assert out3.shape == (3, 5)
    checks.append((out3, _reference(xr, tr, reduction="none")))

    # 4) 1D input (area axis = last axis only).
    x1 = jax.random.uniform(kx, (37,), jnp.float32)
    t1 = jax.random.uniform(kt, (37,), jnp.float32, minval=-1.0, maxval=1.0)
    checks.append((tversky_loss(x1, t1), _reference(x1, t1)))

    # 5) multi-block grid via overrides: accumulation across the spatial axis +
    #    several instance blocks (exercises the "parallel" row axis + the
    #    "arbitrary" accumulator axis: grid (1, 2, 8)).
    xm = jax.random.uniform(kx, (4, 4, 32, 64), jnp.float32)
    tm = jax.random.uniform(kt, (4, 4, 32, 64), jnp.float32, minval=-1.0, maxval=1.0)
    checks.append((tversky_loss(xm, tm, block_rows=8, block_lanes=256),
                   _reference(xm, tm)))

    # 6) packed int8 {0,1} mask targets (dtype-aware sublane unit + in-kernel cast).
    ti8 = jax.random.bernoulli(kb, 0.3, (2, 4, 16, 16)).astype(jnp.int8)
    checks.append((tversky_loss(x, ti8), _reference(x, ti8)))

    for out, ref in checks:
        out = jax.block_until_ready(out)
        assert jnp.allclose(out, ref, rtol=1e-5, atol=1e-5), (out, ref)

    print("KERNEL_OK")
</pallas_src>

<mosaic_0001>
module attributes {stable_mosaic.version = 11 : i64} {
  func.func @_tversky_sums_kernel(%arg0: i32, %arg1: i32, %arg2: i32, %arg3: memref<8x128xf32, #tpu.memory_space<vmem>>, %arg4: memref<8x128xf32, #tpu.memory_space<vmem>>, %arg5: memref<1x8x1xf32, #tpu.memory_space<vmem>>, %arg6: memref<1x8x1xf32, #tpu.memory_space<vmem>>, %arg7: memref<1x8x1xf32, #tpu.memory_space<vmem>>) attributes {dimension_semantics = [#tpu.dimension_semantics<parallel>, #tpu.dimension_semantics<parallel>, #tpu.dimension_semantics<arbitrary>], iteration_bounds = array<i64: 2, 1, 1>, scalar_prefetch = 0 : i64, scratch_operands = 0 : i64, tpu.core_type = #tpu.core_type<tc>, window_params = [{transform_indices = @transform_0, window_bounds = array<i64: 8, 128>}, {transform_indices = @transform_1, window_bounds = array<i64: 8, 128>}, {transform_indices = @transform_2, window_bounds = array<i64: 1, 8, 1>}, {transform_indices = @transform_3, window_bounds = array<i64: 1, 8, 1>}, {transform_indices = @transform_4, window_bounds = array<i64: 1, 8, 1>}]} {
    %c0_i32 = arith.constant 0 : i32
    %0 = arith.cmpi eq, %arg2, %c0_i32 : i32
    %1 = arith.extui %0 : i1 to i32
    %c0_i32_0 = arith.constant 0 : i32
    %2 = arith.cmpi ne, %1, %c0_i32_0 : i32
    scf.if %2 {
      %cst_25 = arith.constant 0.000000e+00 : f32
      %34 = vector.broadcast %cst_25 : f32 to vector<8x1xf32>
      %c0_26 = arith.constant 0 : index
      %c0_27 = arith.constant 0 : index
      %c0_28 = arith.constant 0 : index
      %35 = vector.load %arg5[%c0_26, %c0_27, %c0_28] : memref<1x8x1xf32, #tpu.memory_space<vmem>>, vector<1x8x1xf32>
      %36 = vector.shape_cast %35 : vector<1x8x1xf32> to vector<8x1xf32>
      %37 = vector.shape_cast %34 : vector<8x1xf32> to vector<1x8x1xf32>
      tpu.vector_store %arg5[%c0_26, %c0_27, %c0_28], %37 {strides = array<i32>} : memref<1x8x1xf32, #tpu.memory_space<vmem>>, vector<1x8x1xf32>,
      %cst_29 = arith.constant 0.000000e+00 : f32
      %38 = vector.broadcast %cst_29 : f32 to vector<8x1xf32>
      %c0_30 = arith.constant 0 : index
      %c0_31 = arith.constant 0 : index
      %c0_32 = arith.constant 0 : index
      %39 = vector.load %arg6[%c0_30, %c0_31, %c0_32] : memref<1x8x1xf32, #tpu.memory_space<vmem>>, vector<1x8x1xf32>
      %40 = vector.shape_cast %39 : vector<1x8x1xf32> to vector<8x1xf32>
      %41 = vector.shape_cast %38 : vector<8x1xf32> to vector<1x8x1xf32>
      tpu.vector_store %arg6[%c0_30, %c0_31, %c0_32], %41 {strides = array<i32>} : memref<1x8x1xf32, #tpu.memory_space<vmem>>, vector<1x8x1xf32>,
      %cst_33 = arith.constant 0.000000e+00 : f32
      %42 = vector.broadcast %cst_33 : f32 to vector<8x1xf32>
      %c0_34 = arith.constant 0 : index
      %c0_35 = arith.constant 0 : index
      %c0_36 = arith.constant 0 : index
      %43 = vector.load %arg7[%c0_34, %c0_35, %c0_36] : memref<1x8x1xf32, #tpu.memory_space<vmem>>, vector<1x8x1xf32>
      %44 = vector.shape_cast %43 : vector<1x8x1xf32> to vector<8x1xf32>
      %45 = vector.shape_cast %42 : vector<8x1xf32> to vector<1x8x1xf32>
      tpu.vector_store %arg7[%c0_34, %c0_35, %c0_36], %45 {strides = array<i32>} : memref<1x8x1xf32, #tpu.memory_space<vmem>>, vector<1x8x1xf32>,
    } else {
    }
    %c0 = arith.constant 0 : index
    %c0_1 = arith.constant 0 : index
    %3 = vector.load %arg3[%c0, %c0_1] : memref<8x128xf32, #tpu.memory_space<vmem>>, vector<8x128xf32>
    %c0_2 = arith.constant 0 : index
    %c0_3 = arith.constant 0 : index
    %4 = vector.load %arg4[%c0_2, %c0_3] : memref<8x128xf32, #tpu.memory_space<vmem>>, vector<8x128xf32>
    %cst = arith.constant 0.000000e+00 : f32
    %5 = vector.broadcast %cst : f32 to vector<8x128xf32>
    %6 = arith.cmpf ogt, %4, %5 : vector<8x128xf32>
    %7 = arith.extui %6 : vector<8x128xi1> to vector<8x128xi32>
    %8 = arith.sitofp %7 : vector<8x128xi32> to vector<8x128xf32>
    %c0_4 = arith.constant 0 : index
    %c0_5 = arith.constant 0 : index
    %c0_6 = arith.constant 0 : index
    %9 = vector.load %arg5[%c0_4, %c0_5, %c0_6] : memref<1x8x1xf32, #tpu.memory_space<vmem>>, vector<1x8x1xf32>
    %10 = vector.shape_cast %9 : vector<1x8x1xf32> to vector<8x1xf32>
    %11 = arith.mulf %8, %3 : vector<8x128xf32>
    %cst_7 = arith.constant dense<0.000000e+00> : vector<8xf32>
    %12 = vector.multi_reduction <add>, %11, %cst_7 [1] : vector<8x128xf32> to vector<8xf32>
    %13 = vector.shape_cast %12 : vector<8xf32> to vector<8x1xf32>
    %14 = arith.addf %10, %13 : vector<8x1xf32>
    %c0_8 = arith.constant 0 : index
    %c0_9 = arith.constant 0 : index
    %c0_10 = arith.constant 0 : index
    %15 = vector.load %arg5[%c0_8, %c0_9, %c0_10] : memref<1x8x1xf32, #tpu.memory_space<vmem>>, vector<1x8x1xf32>
    %16 = vector.shape_cast %15 : vector<1x8x1xf32> to vector<8x1xf32>
    %17 = vector.shape_cast %14 : vector<8x1xf32> to vector<1x8x1xf32>
    tpu.vector_store %arg5[%c0_8, %c0_9, %c0_10], %17 {strides = array<i32>} : memref<1x8x1xf32, #tpu.memory_space<vmem>>, vector<1x8x1xf32>,
    %c0_11 = arith.constant 0 : index
    %c0_12 = arith.constant 0 : index
    %c0_13 = arith.constant 0 : index
    %18 = vector.load %arg6[%c0_11, %c0_12, %c0_13] : memref<1x8x1xf32, #tpu.memory_space<vmem>>, vector<1x8x1xf32>
    %19 = vector.shape_cast %18 : vector<1x8x1xf32> to vector<8x1xf32>
    %cst_14 = arith.constant dense<0.000000e+00> : vector<8xf32>
    %20 = vector.multi_reduction <add>, %3, %cst_14 [1] : vector<8x128xf32> to vector<8xf32>
    %21 = vector.shape_cast %20 : vector<8xf32> to vector<8x1xf32>
    %22 = arith.addf %19, %21 : vector<8x1xf32>
    %c0_15 = arith.constant 0 : index
    %c0_16 = arith.constant 0 : index
    %c0_17 = arith.constant 0 : index
    %23 = vector.load %arg6[%c0_15, %c0_16, %c0_17] : memref<1x8x1xf32, #tpu.memory_space<vmem>>, vector<1x8x1xf32>
    %24 = vector.shape_cast %23 : vector<1x8x1xf32> to vector<8x1xf32>
    %25 = vector.shape_cast %22 : vector<8x1xf32> to vector<1x8x1xf32>
    tpu.vector_store %arg6[%c0_15, %c0_16, %c0_17], %25 {strides = array<i32>} : memref<1x8x1xf32, #tpu.memory_space<vmem>>, vector<1x8x1xf32>,
    %c0_18 = arith.constant 0 : index
    %c0_19 = arith.constant 0 : index
    %c0_20 = arith.constant 0 : index
    %26 = vector.load %arg7[%c0_18, %c0_19, %c0_20] : memref<1x8x1xf32, #tpu.memory_space<vmem>>, vector<1x8x1xf32>
    %27 = vector.shape_cast %26 : vector<1x8x1xf32> to vector<8x1xf32>
    %cst_21 = arith.constant dense<0.000000e+00> : vector<8xf32>
    %28 = vector.multi_reduction <add>, %8, %cst_21 [1] : vector<8x128xf32> to vector<8xf32>
    %29 = vector.shape_cast %28 : vector<8xf32> to vector<8x1xf32>
    %30 = arith.addf %27, %29 : vector<8x1xf32>
    %c0_22 = arith.constant 0 : index
    %c0_23 = arith.constant 0 : index
    %c0_24 = arith.constant 0 : index
    %31 = vector.load %arg7[%c0_22, %c0_23, %c0_24] : memref<1x8x1xf32, #tpu.memory_space<vmem>>, vector<1x8x1xf32>
    %32 = vector.shape_cast %31 : vector<1x8x1xf32> to vector<8x1xf32>
    %33 = vector.shape_cast %30 : vector<8x1xf32> to vector<1x8x1xf32>
    tpu.vector_store %arg7[%c0_22, %c0_23, %c0_24], %33 {strides = array<i32>} : memref<1x8x1xf32, #tpu.memory_space<vmem>>, vector<1x8x1xf32>,
    return
  }
  func.func @transform_0(%arg0: i32, %arg1: i32, %arg2: i32) -> (i32, i32) {
    %c1_i32 = arith.constant 1 : i32
    %0 = arith.muli %arg0, %c1_i32 : i32
    %1 = arith.addi %0, %arg2 : i32
    %c0_i32 = arith.constant 0 : i32
    return %arg1, %1 : i32, i32
  }
  func.func @transform_1(%arg0: i32, %arg1: i32, %arg2: i32) -> (i32, i32) {
    %c1_i32 = arith.constant 1 : i32
    %0 = arith.muli %arg0, %c1_i32 : i32
    %1 = arith.addi %0, %arg2 : i32
    %c0_i32 = arith.constant 0 : i32
    return %arg1, %1 : i32, i32
  }
  func.func @transform_2(%arg0: i32, %arg1: i32, %arg2: i32) -> (i32, i32, i32) {
    %c0_i32 = arith.constant 0 : i32
    %c0_i32_0 = arith.constant 0 : i32
    return %arg0, %arg1, %c0_i32 : i32, i32, i32
  }
  func.func @transform_3(%arg0: i32, %arg1: i32, %arg2: i32) -> (i32, i32, i32) {
    %c0_i32 = arith.constant 0 : i32
    %c0_i32_0 = arith.constant 0 : i32
    return %arg0, %arg1, %c0_i32 : i32, i32, i32
  }
  func.func @transform_4(%arg0: i32, %arg1: i32, %arg2: i32) -> (i32, i32, i32) {
    %c0_i32 = arith.constant 0 : i32
    %c0_i32_0 = arith.constant 0 : i32
    return %arg0, %arg1, %c0_i32 : i32, i32, i32
  }
}

</mosaic_0001>

<bundles_post_ra>
// kernel: tpu_custom_call.1
= control target key start
LH: loop header
LB: loop body
LE: loop exit
PB: predicated region body
PF: predicated region fallthrough
CT: control target
= control target key end

     0   :  { %10 = vsyncpa [#allocation3], 0  ;;  %s913_s0 = inlined_call_operand.hbm [shape: f32[8,256], index: 0, kind: input, shape index: {}]   ;;  %s914_s1 = inlined_call_operand.hbm [shape: f32[8,256], index: 1, kind: input, shape index: {}]   ;;  %s915_s2 = inlined_call_operand.vmem [shape: f32[2,8,1], index: 2, kind: output, shape index: {0}]   ;;  %s916_s3 = inlined_call_operand.vmem [shape: f32[2,8,1], index: 3, kind: output, shape index: {1}]   ;;  %s917_s4 = inlined_call_operand.vmem [shape: f32[2,8,1], index: 4, kind: output, shape index: {2}]  }
   0x1   :  { %12 = vsyncpa [#allocation3 + $0x1], 0 }
   0x2   :  { %13 = vsyncpa [#allocation5], 0 }
   0x3   :  { %15 = vsyncpa [#allocation5 + $0x1], 0  ;;  %s775_s15 = smov 0   ;;  %s777_s16 = smov 0  }
   0x4   :  { %s779_s17 = smov 0   ;;  %s781_s18 = smov 0  }
   0x5   :  { %s783_s19 = smov 0   ;;  %s785_s20 = smov 0  }
   0x6 LB: > { %s557_s21 = sadd.s32 4294967295, %s745_s20   ;;  %s40_s22 = sadd.s32 1, %s741_s19  ;;  %s745_s20 = sphi %s785_s20, %s21_s20   ;;  %s741_s19 = sphi %s783_s19, %s926_s19   ;;  %s737_s18 = sphi %s781_s18, %s925_s18   ;;  %s733_s17 = sphi %s779_s17, %s924_s17   ;;  %s729_s16 = sphi %s777_s16, %s923_s16   ;;  %s725_s15 = sphi %s775_s15, %s922_s15  }
   0x7   : > { %p42_p0 = scmp.ge.s32.totalorder %s40_s22, 2  ;;  %s51_s23 = sadd.s32 1, %s733_s17 }
   0x8   : > { %p58_p1 = scmp.ne.s32.totalorder %s733_s17, %s729_s16  ;;  %p59_p2 = scmp.eq.s32.totalorder %s745_s20, 0 }
   0x9   : > { %s928_s22 = smov (%p42_p0, %s40_s22), 0  ;;  %p64_p4 = scmp.ne.s32.totalorder %s729_s16, %s725_s15 }
   0xa   : > { %p811_p3 = por %p59_p2, %p58_p1  ;;  %s47_s25 = ssub.s32 %s741_s19, %s928_s22 }
   0xb   : > { %p65_p5 = scmp.eq.s32.totalorder %s557_s21, 0  ;;  %p49_p6 = scmp.eq.s32.totalorder %s47_s25, 0 }
   0xc   : > { %p585_p8 = scmp.lt.s32.totalorder %s745_s20, 2  ;;  %s827_s28 = sand.u32 1, %s733_s17  }
   0xd   : > { %p818_p7 = por %p65_p5, %p64_p4  ;;  %s562_s29 = sshll.u32 %s741_s19, 7 }
   0xe   : > { %s824_s27 = scalar_select %p49_p6, %s733_s17, %s51_s23  }
   0xf   : > { %s561_s30 = sshll.u32 %s827_s28, 3  ;;  %s214_s7 = scalar_lea.hbm %s913_s0, %s562_s29 }
  0x10   : > { %s206_s8 = scalar_lea.vmem [#allocation2], %s561_s30  ;;  %p836_p9 = pnand %p585_p8, %p811_p3 }
  0x11   : > { %s216_s9 = sshll.u32 %s206_s8, 4  ;;  %p565_p10 = scmp.ge.s32.totalorder %s745_s20, 1  ;;  %s217_s9 = int_to_ptr.vmem [resolvable:$true] %s216_s9 }
  0x12   : > { %p242_p11 = scmp.lt.s32.totalorder %s745_s20, 3  ;;  %s203_s11 = scalar_lea.sflag [#allocation3], %s827_s28 }
  0x13   : > { %p637_p12 = pneg %p836_p9  ;;  %s648_s12 = scalar_lea.vmem %s217_s9, 128 }
  0x14   : > { %p649_p13 = scmp.ne.s32.totalorder %s217_s9, %s648_s12  ;;  %s747_s13 = smov [#allocation2]  }
  0x15   : > { %s653_s14 = sshll.u32 %s747_s13, 4  ;;  %s654_s14 = int_to_ptr.vmem [resolvable:$false] %s653_s14 }
  0x16   : > { %p651_p0 = pnand %p649_p13, %p637_p12  ;;  %s655_s15 = scalar_lea.vmem %s654_s14, 256 }
  0x17   : > { %p656_p2 = scmp.lt.s32.totalorder %s217_s9, %s654_s14  ;;  %p657_p3 = scmp.lt.s32.totalorder %s655_s15, %s648_s12 }
  0x18   : > { %p652_p1 = pneg %p651_p0 }
  0x19   : > { %p658_p4 = por %p657_p3, %p656_p2 }
  0x1b   : > { %p659_p5 = pnand %p658_p4, %p652_p1 }
  0x1d   : > { %662 = shalt.err (!%p659_p5)
}
  0x1e   : > { %581 = dma.hbm_to_vmem [thread:$0]  (!%p836_p9), %s214_s7, 128, %s217_s9, %s203_s11  }
  0x1f   : > { %p854_p6 = pnand %p565_p10, %p242_p11  ;;  %s235_s25 = scalar_lea.hbm %s914_s1, %s562_s29 }
  0x20   : > { %s227_s5 = scalar_lea.vmem [#allocation4], %s561_s30  ;;  %s224_s8 = scalar_lea.sflag [#allocation5], %s827_s28 }
  0x21   : > { %s237_s6 = sshll.u32 %s227_s5, 4  ;;  %s748_s7 = smov [#allocation4]   ;;  %s238_s6 = int_to_ptr.vmem [resolvable:$true] %s237_s6 }
  0x22   : > { %s676_s12 = scalar_lea.vmem %s238_s6, 128  ;;  %s681_s9 = sshll.u32 %s748_s7, 4  ;;  %s682_s9 = int_to_ptr.vmem [resolvable:$false] %s681_s9 }
  0x23   : > { %p677_p8 = scmp.ne.s32.totalorder %s238_s6, %s676_s12  ;;  %s683_s11 = scalar_lea.vmem %s682_s9, 256 }
  0x24   : > { %p684_p10 = scmp.lt.s32.totalorder %s238_s6, %s682_s9  ;;  %p685_p11 = scmp.lt.s32.totalorder %s683_s11, %s676_s12 }
  0x25   : > { %p679_p13 = pnand %p677_p8, %p637_p12 }
  0x26   : > { %p686_p1 = por %p685_p11, %p684_p10 }
  0x27   : > { %p680_p0 = pneg %p679_p13 }
  0x29   : > { %p687_p2 = pnand %p686_p1, %p680_p0 }
  0x2b   : > { %690 = shalt.err (!%p687_p2)
}
  0x2c   : > { %584 = dma.hbm_to_vmem [thread:$0]  (!%p836_p9), %s235_s25, 128, %s238_s6, %s224_s8  }
  0x2d   : > { %246 = sbr.rel (%p854_p6) target bundleno = 203 (0xcb), region = 28  ;;  %s248_s28 = sand.u32 (!%p854_p6), 1, %s729_s16  }
  0x2e   : > { %s566_s29 = sshll.u32 (!%p854_p6), %s248_s28, 3  ;;  %s249_s30 = scalar_lea.sflag (!%p854_p6), [#allocation3], %s248_s28 }
  0x2f   : > { %s252_s13 = scalar_lea.vmem (!%p854_p6), [#allocation2], %s566_s29 }
  0x32   : > { %716 = dma.done.wait (%p818_p7), %s249_s30, 128  }
  0x33   : > { %718 = vsyncadd (%p818_p7), %s249_s30, 4294967168  ;;  %s258_s14 = scalar_lea.sflag [#allocation5], %s248_s28  ;;  %s261_s15 = scalar_lea.vmem [#allocation4], %s566_s29 }
  0x34   : > { %720 = dma.done.wait (%p818_p7), %s258_s14, 128  }
  0x35   : > { %722 = vsyncadd (%p818_p7), %s258_s14, 4294967168  ;;  %p309_p9 = scmp.lt.s32.totalorder %s737_s18, 1  ;;  %vm334_vm0 = vcmask 7168   ;;  %v749_v0 = vmov 0.0   ;;  %v338_v1 = vld [vmem:[%s252_s13] sm:$0xff]  ;;  %v339_v2 = vld [vmem:[%s261_s15] sm:$0xff] }
  0x36   : > { %vm340_vm1 = vcmp.gt.f32.partialorder %v339_v2, 0.0 }
  0x37   : > { %s930_s18 = smov (!%p309_p9, %s737_s18), 1  ;;  %v571_v3 = vsel %vm340_vm1, 1.0, %v749_v0 }
  0x38   : > { %s568_s10 = sshll.u32 %s930_s18, 3  ;;  %v344_v4 = vmul.f32 %v571_v3, %v338_v1  ;;  %356 = vadd.xlane.f32.xlu1 %v571_v3 }
  0x39   : > { %s315_s24 = scalar_lea.vmem %s915_s2, %s568_s10  ;;  %s329_s5 = scalar_lea.vmem %s917_s4, %s568_s10 }
  0x3a   : > { %335 = vst.msk [vmem:[%s315_s24] sm:$0xff] %vm334_vm0, %v749_v0  ;;  %345 = vadd.xlane.f32.xlu0 %v344_v4  ;;  %s322_s8 = scalar_lea.vmem %s916_s3, %s568_s10  ;;  %337 = vst.msk [vmem:[%s329_s5] sm:$0xff] %vm334_vm0, %v749_v0 }
  0x3b   : > { %336 = vst.msk [vmem:[%s322_s8] sm:$0xff] %vm334_vm0, %v749_v0 }
  0x3e   : > { %351 = vadd.xlane.f32.xlu0 %v338_v1 }
  0x41   : > { %v355_v5 = vld [vmem:[%s329_s5] sm:$0xff] }
  0x42   : > { %v343_v6 = vld [vmem:[%s315_s24] sm:$0xff] }
  0x43   : > { %v350_v11 = vld [vmem:[%s322_s8] sm:$0xff] }
  0xc1   : > { %v357_v7 = vpop.xlane.xlu1 %356 }
  0xc2   : > { %v358_v8 = vadd.f32 %v357_v7, %v355_v5 }
  0xc3   : > { %v346_v9 = vpop.xlane.xlu0 %345 }
  0xc4   : > { %v347_v10 = vadd.f32 %v346_v9, %v343_v6  ;;  %359 = vst.msk [vmem:[%s329_s5] sm:$0xff] %vm334_vm0, %v358_v8 }
  0xc6   : > { %349 = vst.msk [vmem:[%s315_s24] sm:$0xff] %vm334_vm0, %v347_v10 }
  0xc7   : > { %v352_v12 = vpop.xlane.xlu0 %351 }
  0xc8   : > { %v353_v13 = vadd.f32 %v352_v12, %v350_v11 }
  0xca   : > { %354 = vst.msk [vmem:[%s322_s8] sm:$0xff] %vm334_vm0, %v353_v13 }
  0xcb PF: > { %s21_s20 = sadd.s32 1, %s745_s20   ;;  %s922_s15 = smov %s729_s16 }
  0xcc   : > { %p18_p7 = scmp.ge.s32.totalorder %s21_s20, 4   ;;  %s923_s16 = smov %s733_s17 }
  0xcd   : > { %s924_s17 = smov %s824_s27  ;;  %s925_s18 = smov %s741_s19 }
  0xce   : > { %s926_s19 = smov %s928_s22  ;;  %20 = sbr.rel (!%p18_p7) target bundleno = 6 (0x6), region = 109 }
  0xd3   :  { %425 = vsyncpa [#allocation3], 1 }
  0xd4   :  { %427 = vsyncpa [#allocation3 + $0x1], 1 }
  0xd5   :  { %428 = vsyncpa [#allocation5], 1 }
  0xd6   :  { %430 = vsyncpa [#allocation5 + $0x1], 1 }

</bundles_post_ra>
